<compile_context>
chip_gen: v7x
topology: tpu7x:2x2x1
jax: 0.10.0
libtpu: 0.0.40
codegen_flags: <defaults>
</compile_context>

<pallas_src>
import functools

import jax
import jax.numpy as jnp
from jax.experimental import pallas as pl
from jax.experimental.pallas import tpu as pltpu


# ---------------------------------------------------------------------------
# Kernels
# ---------------------------------------------------------------------------
def _rmsnorm_kernel(x_ref, o_ref, *, eps: float, f32_scale: bool):
    x = x_ref[...]                                           # (tm, D)
    x32 = x.astype(jnp.float32)
    ms = jnp.mean(x32 * x32, axis=-1, keepdims=True)         # (tm, 1) f32
    inv = jax.lax.rsqrt(ms + eps)                            # (tm, 1) f32
    if f32_scale or x.dtype == jnp.float32:
        y = x32 * inv
    else:
        # v6e/v7x only: keep the big (tm, D) intermediate in the input dtype
        # (bf16/fp16); only the reduction + rsqrt need f32.
        y = x * inv.astype(x.dtype)
    o_ref[...] = y.astype(o_ref.dtype)


def _rmsnorm_affine_kernel(x_ref, w_ref, o_ref, *, eps: float, f32_scale: bool):
    x = x_ref[...]                                           # (tm, D)
    x32 = x.astype(jnp.float32)
    ms = jnp.mean(x32 * x32, axis=-1, keepdims=True)         # (tm, 1) f32
    inv = jax.lax.rsqrt(ms + eps)                            # (tm, 1) f32
    if f32_scale or x.dtype == jnp.float32:
        y = (x32 * inv) * w_ref[...].astype(jnp.float32)
    else:
        y = (x * inv.astype(x.dtype)) * w_ref[...].astype(x.dtype)
    o_ref[...] = y.astype(o_ref.dtype)


# ---------------------------------------------------------------------------
# Hardware / tiling helpers
# ---------------------------------------------------------------------------
def _vmem_capacity_bytes() -> int:
    try:
        return int(pltpu.get_tpu_info().vmem_capacity_bytes)
    except Exception:
        # Conservative fallback = v7x per-TC physical VMEM (64 MiB).
        return 64 * 1024 * 1024


def _device_kind() -> str:
    try:
        return jax.devices()[0].device_kind.lower()
    except Exception:
        return ""


def _use_low_precision_scale(dtype) -> bool:
    """Use the input-dtype scale multiply only where a bf16 VALU exists
    (v6e/v7x).  Elsewhere the compiler widens to f32 anyway, so the low
    precision path costs accuracy for zero work saved (v5e)."""
    if jnp.dtype(dtype).itemsize >= 4:
        return False
    kind = _device_kind()
    return ("v6" in kind) or ("v7" in kind)


def _sublane_pack(dtype) -> int:
    itemsize = jnp.dtype(dtype).itemsize
    return {4: 8, 2: 16, 1: 32}.get(itemsize, 8)


def _per_row_vmem_bytes(d: int, itemsize: int) -> int:
    # Double-buffered in + out tiles (4 buffers) plus one compute-scoped f32
    # working copy for sub-32-bit inputs.
    b = 4 * d * itemsize
    if itemsize < 4:
        b += d * 4
    return max(1, b)


def _choose_block_rows(rows: int, d: int, dtype) -> int:
    """Pick a row-tile size: large enough to amortize per-step pipeline
    overhead, small enough that the buffer set fits VMEM comfortably."""
    itemsize = jnp.dtype(dtype).itemsize
    sublane = _sublane_pack(dtype)
    vmem = _vmem_capacity_bytes()

    # 8 MiB tiles on 128 MiB parts (v5e/v6e), 4 MiB on 64 MiB parts (v7x).
    # Both sit at the HBM-roofline plateau for this streaming kernel.
    target_tile_bytes = 8 * 1024 * 1024 if vmem >= (96 << 20) else 4 * 1024 * 1024
    target_tile_bytes = min(target_tile_bytes, vmem // 8)

    tm = max(sublane, target_tile_bytes // max(1, d * itemsize))
    tm = max(sublane, (tm // sublane) * sublane)              # sublane multiple

    # Do not exceed the (sublane-rounded) row count.
    rows_cap = ((rows + sublane - 1) // sublane) * sublane
    tm = min(tm, rows_cap)
    tm = max(sublane, (tm // sublane) * sublane)
    return tm


# ---------------------------------------------------------------------------
# Wrapper
# ---------------------------------------------------------------------------
def rms_norm(x: jnp.ndarray,
             weight: jnp.ndarray | None = None,
             eps: float = 1e-6,
             block_rows: int | None = None) -> jnp.ndarray:
    """RMSNorm over the last axis of `x` (any leading shape)."""
    orig_shape = x.shape
    d = orig_shape[-1]
    rows = 1
    for s in orig_shape[:-1]:
        rows *= s
    x2d = x.reshape(rows, d)

    affine = weight is not None
    itemsize = jnp.dtype(x.dtype).itemsize
    sublane = _sublane_pack(x.dtype)
    vmem_cap = _vmem_capacity_bytes()

    tm = block_rows if block_rows is not None else _choose_block_rows(rows, d, x.dtype)
    tm = max(sublane, (tm // sublane) * sublane)

    # Cap tm so double-buffered in/out tiles + the f32 working copy always
    # fit physical VMEM with headroom (matters for user block_rows on v7x).
    usable_vmem = max(8 << 20, vmem_cap - (16 << 20))
    max_tm = max(sublane,
                 (usable_vmem // _per_row_vmem_bytes(d, itemsize) // sublane) * sublane)
    tm = min(tm, max_tm)

    # Megacore (v7x has 2 TCs): ensure the single parallel grid axis has at
    # least two blocks whenever there is more than one sublane group of rows.
    if block_rows is None and pl.cdiv(rows, tm) < 2 and rows > sublane and tm > sublane:
        tm = max(sublane, ((tm // 2) // sublane) * sublane)

    n_blocks = pl.cdiv(rows, tm)     # grid over-covers; ragged last block is
    grid = (n_blocks,)               # padded on read / masked on write.

    # Explicit VMEM budget: double-buffered x in + y out tiles, one
    # compute-scoped f32 working copy for packed dtypes, plus weight,
    # with headroom — clamped to physical VMEM minus 8 MiB (v7x-safe).
    tile_bytes = tm * d * itemsize
    f32_temp_bytes = tm * d * 4 if itemsize < 4 else 0
    w_bytes = 2 * d * jnp.dtype(weight.dtype).itemsize if affine else 0
    vmem_limit = int(1.25 * (4 * tile_bytes + f32_temp_bytes + w_bytes)) + (2 << 20)
    vmem_limit = max(vmem_limit, 16 << 20)
    vmem_limit = min(vmem_limit, vmem_cap - (8 << 20))

    compiler_params = pltpu.CompilerParams(
        dimension_semantics=("parallel",),   # row blocks are independent
        vmem_limit_bytes=int(vmem_limit),
    )

    f32_scale = not _use_low_precision_scale(x.dtype)

    out_shape = jax.ShapeDtypeStruct((rows, d), x.dtype)
    x_spec = pl.BlockSpec((tm, d), lambda i: (i, 0))
    o_spec = pl.BlockSpec((tm, d), lambda i: (i, 0))

    if affine:
        # Weight kept in its native dtype; constant block index -> the
        # pipeline only fetches it once (no per-step re-DMA).
        w2d = weight.reshape(1, d)
        out = pl.pallas_call(
            functools.partial(_rmsnorm_affine_kernel, eps=eps, f32_scale=f32_scale),
            out_shape=out_shape,
            grid_spec=pltpu.PrefetchScalarGridSpec(
                num_scalar_prefetch=0,
                grid=grid,
                in_specs=[
                    x_spec,
                    pl.BlockSpec((1, d), lambda i: (0, 0)),   # weight, constant block
                ],
                out_specs=o_spec,
            ),
            compiler_params=compiler_params,
        )(x2d, w2d)
    else:
        out = pl.pallas_call(
            functools.partial(_rmsnorm_kernel, eps=eps, f32_scale=f32_scale),
            out_shape=out_shape,
            grid_spec=pltpu.PrefetchScalarGridSpec(
                num_scalar_prefetch=0,
                grid=grid,
                in_specs=[x_spec],
                out_specs=o_spec,
            ),
            compiler_params=compiler_params,
        )(x2d)

    return out.reshape(orig_shape)


# ---------------------------------------------------------------------------
# Pure-JAX reference
# ---------------------------------------------------------------------------
def _rms_norm_ref(x, weight=None, eps=1e-6):
    x32 = x.astype(jnp.float32)
    y = x32 * jax.lax.rsqrt(jnp.mean(x32 * x32, axis=-1, keepdims=True) + eps)
    if weight is not None:
        y = y * weight.astype(jnp.float32)
    return y.astype(x.dtype)


if __name__ == "__main__":
    key = jax.random.PRNGKey(0)
    kx, kw, kb = jax.random.split(key, 3)

    batch, seq, hidden = 2, 8, 32
    x = jax.random.normal(kx, (batch, seq, hidden), dtype=jnp.float32)

    # 1) elementwise_affine=False (default in the PyTorch module)
    y_plain = rms_norm(x, weight=None, eps=1e-6)
    jax.block_until_ready(y_plain)
    ref_plain = _rms_norm_ref(x, None, 1e-6)
    assert jnp.allclose(y_plain, ref_plain, atol=1e-5, rtol=1e-5)

    # 2) elementwise_affine=True (weight synthesized deterministically)
    weight = jax.random.normal(kw, (hidden,), dtype=jnp.float32)
    y_affine = rms_norm(x, weight=weight, eps=1e-6)
    jax.block_until_ready(y_affine)
    ref_affine = _rms_norm_ref(x, weight, 1e-6)
    assert jnp.allclose(y_affine, ref_affine, atol=1e-5, rtol=1e-5)

    # 3) bf16 input with leading dims that do NOT divide the row tile
    #    (exercises the ragged last block — no pad/slice round-trips anymore).
    xb = jax.random.normal(kb, (3, 5, hidden), dtype=jnp.bfloat16)
    y_b = rms_norm(xb, weight=weight, eps=1e-6)
    jax.block_until_ready(y_b)
    ref_b = _rms_norm_ref(xb, weight, 1e-6)
    assert jnp.allclose(y_b.astype(jnp.float32), ref_b.astype(jnp.float32),
                        atol=0.1, rtol=0.1)
    assert bool(jnp.all(jnp.isfinite(y_b.astype(jnp.float32))))

    print("KERNEL_OK")
</pallas_src>

<mosaic_0001>
module attributes {stable_mosaic.version = 11 : i64} {
  func.func @_rmsnorm_kernel(%arg0: i32, %arg1: memref<8x32xf32, #tpu.memory_space<vmem>>, %arg2: memref<8x32xf32, #tpu.memory_space<vmem>>) attributes {dimension_semantics = [#tpu.dimension_semantics<parallel>], iteration_bounds = array<i64: 2>, scalar_prefetch = 0 : i64, scratch_operands = 0 : i64, tpu.core_type = #tpu.core_type<tc>, window_params = [{transform_indices = @transform_0, window_bounds = array<i64: 8, 32>}, {transform_indices = @transform_1, window_bounds = array<i64: 8, 32>}]} {
    %c0 = arith.constant 0 : index
    %c0_0 = arith.constant 0 : index
    %0 = vector.load %arg1[%c0, %c0_0] : memref<8x32xf32, #tpu.memory_space<vmem>>, vector<8x32xf32>
    %1 = arith.mulf %0, %0 : vector<8x32xf32>
    %cst = arith.constant dense<0.000000e+00> : vector<8xf32>
    %2 = vector.multi_reduction <add>, %1, %cst [1] : vector<8x32xf32> to vector<8xf32>
    %3 = vector.shape_cast %2 : vector<8xf32> to vector<8x1xf32>
    %cst_1 = arith.constant 3.200000e+01 : f32
    %4 = vector.broadcast %cst_1 : f32 to vector<8x1xf32>
    %5 = arith.divf %3, %4 : vector<8x1xf32>
    %cst_2 = arith.constant 9.99999997E-7 : f32
    %6 = vector.broadcast %cst_2 : f32 to vector<8x1xf32>
    %7 = arith.addf %5, %6 : vector<8x1xf32>
    %8 = math.rsqrt %7 : vector<8x1xf32>
    %9 = vector.broadcast %8 : vector<8x1xf32> to vector<8x32xf32>
    %10 = arith.mulf %0, %9 : vector<8x32xf32>
    %c0_3 = arith.constant 0 : index
    %c0_4 = arith.constant 0 : index
    %11 = vector.load %arg2[%c0_3, %c0_4] : memref<8x32xf32, #tpu.memory_space<vmem>>, vector<8x32xf32>
    tpu.vector_store %arg2[%c0_3, %c0_4], %10 {strides = array<i32>} : memref<8x32xf32, #tpu.memory_space<vmem>>, vector<8x32xf32>,
    return
  }
  func.func @transform_0(%arg0: i32) -> (i32, i32) {
    %c0_i32 = arith.constant 0 : i32
    %c0_i32_0 = arith.constant 0 : i32
    return %arg0, %c0_i32 : i32, i32
  }
  func.func @transform_1(%arg0: i32) -> (i32, i32) {
    %c0_i32 = arith.constant 0 : i32
    %c0_i32_0 = arith.constant 0 : i32
    return %arg0, %c0_i32 : i32, i32
  }
}

</mosaic_0001>

<bundles_post_ra>
// kernel: tpu_custom_call.1
= control target key start
LH: loop header
LB: loop body
LE: loop exit
PB: predicated region body
PF: predicated region fallthrough
CT: control target
= control target key end

     0   :  { %6 = vsyncpa [#allocation3], 0  ;;  %s559_s0 = inlined_call_operand.hbm [shape: f32[16,32], index: 0, kind: input, shape index: {}]   ;;  %s560_s1 = inlined_call_operand.hbm [shape: f32[16,32], index: 1, kind: output, shape index: {}]  }
   0x1   :  { %8 = vsyncpa [#allocation3 + $0x1], 0 }
   0x2   :  { %9 = vsyncpa [#allocation4], 0 }
   0x3   :  { %11 = vsyncpa [#allocation4 + $0x1], 0  ;;  %s398_s6 = smov 0   ;;  %s400_s7 = smov 0  }
   0x4   :  { %s402_s8 = smov 0   ;;  %s404_s9 = smov 0  }
   0x5 LB: > { %s419_s10 = sadd.s32 4294967295, %s384_s9   ;;  %s228_s11 = sadd.s32 4294967294, %s384_s9   ;;  %s384_s9 = sphi %s404_s9, %s575_s9   ;;  %s380_s8 = sphi %s402_s8, %s574_s8   ;;  %s376_s7 = sphi %s400_s7, %s573_s7   ;;  %s372_s6 = sphi %s398_s6, %s572_s6  }
   0x6   : > { %s423_s12 = sadd.s32 1, %s384_s9   ;;  %s24_s13 = sadd.s32 1, %s380_s8 }
   0x7   : > { %s21_s14 = ssub.s32 %s384_s9, %s423_s12  ;;  %p31_p0 = scmp.ne.s32.totalorder %s380_s8, %s376_s7 }
   0x8   : > { %p22_p1 = scmp.eq.s32.totalorder %s21_s14, 0  ;;  %p32_p2 = scmp.eq.s32.totalorder %s384_s9, 0 }
   0x9   : > { %p37_p3 = scmp.ne.s32.totalorder %s376_s7, %s372_s6  ;;  %p38_p4 = scmp.eq.s32.totalorder %s419_s10, 0 }
   0xa   : > { %s435_s15 = scalar_select %p22_p1, %s380_s8, %s24_s13  }
   0xb   : > { %p437_p5 = por %p32_p2, %p31_p0  ;;  %p441_p6 = por %p38_p4, %p37_p3 }
   0xc   : > { %p61_p7 = scmp.eq.s32.totalorder %s419_s10, 1  ;;  %p67_p8 = scmp.eq.s32.totalorder %s228_s11, 1 }
   0xd   : > { %p252_p10 = scmp.lt.s32.totalorder %s384_s9, 2  ;;  %s87_s20 = sand.u32 1, %s380_s8  }
   0xe   : > { %p448_p11 = por %p61_p7, %p31_p0  ;;  %p452_p12 = por %p67_p8, %p37_p3 }
   0xf   : > { %s232_s21 = sshll.u32 %s384_s9, 7  ;;  %s231_s22 = sshll.u32 %s87_s20, 3 }
  0x10   : > { %s564_s18 = scalar_select %p448_p11, 1, 0 }
  0x11   : > { %s565_s19 = scalar_select %p452_p12, 1, 0 }
  0x12   : > { %s461_s25 = scalar_lea.hbm %s559_s0, %s232_s21  ;;  %s91_s26 = scalar_lea.vmem [#allocation2], %s231_s22 }
  0x13   : > { %s98_s27 = sshll.u32 %s91_s26, 4  ;;  %p465_p13 = pnand %p252_p10, %p437_p5  ;;  %s469_s27 = int_to_ptr.vmem [resolvable:$true] %s98_s27 }
  0x14   : > { %s88_s29 = scalar_lea.sflag [#allocation3], %s87_s20  ;;  %s288_s30 = scalar_lea.hbm %s461_s25, 128 }
  0x15   : > { %p289_p2 = scmp.ne.s32.totalorder %s461_s25, %s288_s30  ;;  %p290_p3 = pneg %p465_p13 }
  0x16   : > { %s293_s4 = scalar_lea.hbm %s559_s0, 256  ;;  %p294_p5 = scmp.lt.u32.totalorder %s461_s25, %s559_s0 }
  0x17   : > { %p291_p4 = pnand %p290_p3, %p289_p2  ;;  %p295_p8 = scmp.lt.u32.totalorder %s293_s4, %s288_s30 }
  0x18   : > { %p297_p9 = scmp.lt.u32.totalorder %s288_s30, %s461_s25 }
  0x19   : > { %p292_p7 = pneg %p291_p4  ;;  %p296_p10 = por %p295_p8, %p294_p5 }
  0x1b   : > { %p298_p0 = por %p297_p9, %p296_p10 }
  0x1d   : > { %p299_p1 = pnand %p298_p0, %p292_p7 }
  0x1f   : > { %302 = shalt.err (!%p299_p1)
}
  0x20   : > { %s303_s13 = scalar_lea.vmem %s469_s27, 128  ;;  %s386_s14 = smov [#allocation2]  }
  0x21   : > { %p304_p2 = scmp.ne.s32.totalorder %s469_s27, %s303_s13  ;;  %s308_s16 = sshll.u32 %s386_s14, 4  ;;  %s309_s16 = int_to_ptr.vmem [resolvable:$false] %s308_s16 }
  0x22   : > { %s310_s20 = scalar_lea.vmem %s309_s16, 256  ;;  %p311_p11 = scmp.lt.s32.totalorder %s469_s27, %s309_s16 }
  0x23   : > { %p306_p4 = pnand %p304_p2, %p290_p3  ;;  %p312_p5 = scmp.lt.s32.totalorder %s310_s20, %s303_s13 }
  0x25   : > { %p307_p12 = pneg %p306_p4  ;;  %p313_p8 = por %p312_p5, %p311_p11 }
  0x27   : > { %p314_p9 = pnand %p313_p8, %p307_p12 }
  0x29   : > { %317 = shalt.err (!%p314_p9)
}
  0x2a   : > { %247 = dma.hbm_to_vmem [thread:$0]  (!%p465_p13), %s461_s25, 128, %s469_s27, %s88_s29  }
  0x2b   : > { %p567_p0 = scmp.lt.s32.totalorder %s384_s9, 3  ;;  %p568_p1 = scmp.ge.s32.totalorder %s384_s9, 1 }
  0x2d   : > { %p104_p3 = pnand %p568_p1, %p567_p0 }
  0x2e   : > { %s503_s21 = sand.u32 (!%p104_p3), 1, %s376_s7  }
  0x2f   : > { %107 = sbr.rel (%p104_p3) target bundleno = 232 (0xe8), region = 24  ;;  %s234_s22 = sshll.u32 (!%p104_p3), %s503_s21, 3 }
  0x30   : > { %s110_s23 = scalar_lea.sflag (!%p104_p3), [#allocation3], %s503_s21  ;;  %s113_s24 = scalar_lea.vmem (!%p104_p3), [#allocation2], %s234_s22 }
  0x36   : > { %363 = dma.done.wait (%p441_p6), %s110_s23, 128  }
  0x37   : > { %365 = vsyncadd (%p441_p6), %s110_s23, 4294967168  ;;  %v132_v0 = vld [vmem:[%s113_s24] sm:$0xff]  ;;  %vm134_vm0 = vcmask 261120   ;;  %s237_s25 = sshll.u32 %s419_s10, 7  ;;  %s131_s26 = scalar_lea.vmem [#allocation5], %s234_s22 }
  0x38   : > { %v133_v1 = vmul.f32 %v132_v0, %v132_v0  ;;  %s158_s27 = sshll.u32 %s131_s26, 4  ;;  %s515_s29 = scalar_lea.hbm %s560_s1, %s237_s25  ;;  %s517_s27 = int_to_ptr.vmem [resolvable:$true] %s158_s27 }
  0x39   : > { %s145_s30 = scalar_lea.sflag [#allocation4], %s503_s21  ;;  %s318_s2 = scalar_lea.vmem %s517_s27, 128 }
  0x3a   : > { %v135_v2 = vsel %vm134_vm0, %v133_v1, 0.0  ;;  %p319_p6 = scmp.ne.s32.totalorder %s517_s27, %s318_s2  ;;  %p569_p11 = scmp.ne.s32.totalorder %s564_s18, 0 }
  0x3b   : > { %136 = vadd.xlane.f32.xlu0 %v135_v2  ;;  %s387_s10 = smov [#allocation5]  }
  0x3c   : > { %p320_p12 = pnand %p319_p6, %p569_p11  ;;  %s322_s3 = sshll.u32 %s387_s10, 4  ;;  %s323_s3 = int_to_ptr.vmem [resolvable:$false] %s322_s3 }
  0x3d   : > { %s324_s4 = scalar_lea.vmem %s323_s3, 256  ;;  %p325_p7 = scmp.lt.s32.totalorder %s517_s27, %s323_s3 }
  0x3e   : > { %p321_p13 = pneg %p320_p12  ;;  %p326_p10 = scmp.lt.s32.totalorder %s324_s4, %s318_s2 }
  0x40   : > { %p327_p2 = por %p326_p10, %p325_p7 }
  0x42   : > { %p328_p4 = pnand %p327_p2, %p321_p13 }
  0xc8   : > { %v137_v3 = vpop.xlane.xlu0 %136 }
  0xc9   : > { %v139_v4 = vmul.f32 0.03125, %v137_v3 }
  0xcb   : > { %v140_v5 = vadd.f32 1e-06, %v139_v4 }
  0xcd   : > { %286 = vrsqrt.f32 %v140_v5 }
  0xd7   : > { %v287_v6 = vpop.eup %286 }
  0xd8   : > { %v142_v7 = vmul.f32 %v287_v6, %v132_v0 }
  0xda   : > { %143 = vst.msk [vmem:[%s131_s26] sm:$0xff] %vm134_vm0, %v142_v7 }
  0xdb   : > { %331 = shalt.err (!%p328_p4)
}
  0xdc   : > { %s332_s5 = scalar_lea.hbm %s515_s29, 128  ;;  %s336_s14 = scalar_lea.hbm %s560_s1, 256 }
  0xdd   : > { %p333_p5 = scmp.ne.s32.totalorder %s515_s29, %s332_s5  ;;  %p337_p0 = scmp.lt.u32.totalorder %s515_s29, %s560_s1 }
  0xde   : > { %p338_p1 = scmp.lt.u32.totalorder %s336_s14, %s332_s5  ;;  %p340_p6 = scmp.lt.u32.totalorder %s332_s5, %s515_s29 }
  0xdf   : > { %p334_p8 = pnand %p333_p5, %p569_p11 }
  0xe0   : > { %p339_p3 = por %p338_p1, %p337_p0 }
  0xe1   : > { %p335_p9 = pneg %p334_p8 }
  0xe2   : > { %p341_p12 = por %p340_p6, %p339_p3 }
  0xe4   : > { %p342_p13 = pnand %p341_p12, %p335_p9 }
  0xe6   : > { %345 = shalt.err (!%p342_p13)
}
  0xe7   : > { %242 = dma.vmem_to_hbm [thread:$0]  (%p569_p11), %s517_s27, 128, %s515_s29, %s145_s30  }
  0xe8 PF: > { %s170_s21 = sand.u32 1, %s372_s6   ;;  %p570_p7 = scmp.ne.s32.totalorder %s565_s19, 0 }
  0xe9   : > { %p571_p10 = scmp.ge.s32.totalorder %s384_s9, 2  ;;  %s171_s22 = scalar_lea.sflag [#allocation4], %s170_s21 }
  0xeb   : > { %p249_p2 = pnand %p571_p10, %p570_p7 }
  0xed   : > { %367 = dma.done.wait (!%p249_p2), %s171_s22, 128  }
  0xee   : > { %369 = vsyncadd (!%p249_p2), %s171_s22, 4294967168  ;;  %p14_p4 = scmp.ge.s32.totalorder %s423_s12, 4   ;;  %s572_s6 = smov %s376_s7 }
  0xef   : > { %s573_s7 = smov %s380_s8  ;;  %s574_s8 = smov %s435_s15 }
  0xf0   : > { %s575_s9 = smov %s423_s12  ;;  %16 = sbr.rel (!%p14_p4) target bundleno = 5 (0x5), region = 69 }
  0xf7   :  { %176 = vsyncpa [#allocation3], 1 }
  0xf8   :  { %178 = vsyncpa [#allocation3 + $0x1], 1 }
  0xf9   :  { %179 = vsyncpa [#allocation4], 1 }
  0xfa   :  { %181 = vsyncpa [#allocation4 + $0x1], 1 }

</bundles_post_ra>
